<compile_context>
chip_gen: v7x
topology: tpu7x:2x2x1
jax: 0.10.0
libtpu: 0.0.40
codegen_flags: <defaults>
</compile_context>

<pallas_src>
import functools

import jax
import jax.numpy as jnp
from jax import lax
from jax.experimental import pallas as pl
from jax.experimental.pallas import tpu as pltpu


_INV_SQRT2 = 0.7071067811865476
_LANE = 128
_MAX_TILE = 2048   # batch rows per grid step; trivially fits VMEM on v5e/v6e/v7x


def _gelu_exact(x):
    # torch.nn.GELU() default = exact erf-based GELU.
    return 0.5 * x * (1.0 + lax.erf(x * _INV_SQRT2))


def mlp_kernel(xT_ref, w1_ref, b1_ref, w2_ref, b2_ref, w3c_ref, b3_ref, o_ref):
    xT = xT_ref[...]                                       # (D_in, TB), batch in lanes

    # fc1 + GELU: (H, D_in) @ (D_in, TB) -> (H, TB); bias broadcasts over lanes.
    h1 = jnp.dot(w1_ref[...], xT, preferred_element_type=jnp.float32)
    h1 = _gelu_exact(h1 + b1_ref[...])

    # fc2 + GELU: (H, H) @ (H, TB) -> (H, TB)
    h2 = jnp.dot(w2_ref[...], h1, preferred_element_type=jnp.float32)
    h2 = _gelu_exact(h2 + b2_ref[...])

    # fc3 (out_dim == 1): VPU mul + cross-sublane reduce instead of an M=1 MXU
    # matmul.  w3c is (H, 1); b3 is a scalar in SMEM.
    out = jnp.sum(h2 * w3c_ref[...], axis=0, keepdims=True) + b3_ref[0, 0]

    o_ref[...] = out.astype(o_ref.dtype)                   # (1, TB) lane-dense store


def _batch_tiling(batch):
    """Returns (tile_rows, padded_batch); tile is a multiple of 128 lanes."""
    b128 = ((batch + _LANE - 1) // _LANE) * _LANE
    if b128 <= _MAX_TILE:
        return b128, b128                                  # single grid step
    tb = _MAX_TILE
    return tb, ((b128 + tb - 1) // tb) * tb


@functools.partial(jax.jit, static_argnames=())
def mlp_forward(x, w1, b1, w2, b2, w3, b3):
    """x: (B, D_in).  Params in torch Linear layout: w_i (out, in), b_i (out,)."""
    batch, d_in = x.shape
    hidden = w1.shape[0]
    out_dim = w3.shape[0]                                  # == 1

    tb, b_pad = _batch_tiling(batch)
    n_tiles = b_pad // tb

    # Layout plumbing (done once by XLA): batch -> lanes, pad to tile multiple.
    xT = jnp.pad(x.T, ((0, 0), (0, b_pad - batch)))        # (D_in, B_pad)
    b1c = b1.reshape(hidden, 1)                            # (H, 1) lane-broadcast bias
    b2c = b2.reshape(hidden, 1)
    w3c = w3.T                                             # (H, 1) for the VPU reduce
    b3s = b3.reshape(1, 1)                                 # scalar -> SMEM

    flops = 2 * b_pad * (d_in * hidden + hidden * hidden + hidden * out_dim)
    bytes_accessed = 4 * (d_in * b_pad + out_dim * b_pad
                          + w1.size + b1.size + w2.size + b2.size
                          + w3.size + b3.size)

    # Constant index map => block stays VMEM-resident across the whole grid.
    resident = lambda a: pl.BlockSpec(a.shape, lambda i: (0,) * a.ndim)

    outT = pl.pallas_call(
        mlp_kernel,
        out_shape=jax.ShapeDtypeStruct((out_dim, b_pad), x.dtype),
        grid=(n_tiles,),
        in_specs=[
            pl.BlockSpec((d_in, tb), lambda i: (0, i)),    # x: batch-tiled
            resident(w1), resident(b1c),
            resident(w2), resident(b2c),
            resident(w3c),
            pl.BlockSpec(memory_space=pltpu.MemorySpace.SMEM),  # b3 scalar
        ],
        out_specs=pl.BlockSpec((out_dim, tb), lambda i: (0, i)),
        compiler_params=pltpu.CompilerParams(
            dimension_semantics=("parallel",),             # megacore sharding on v7x
            vmem_limit_bytes=32 * 1024 * 1024,             # explicit v7x-safe budget
        ),
        cost_estimate=pl.CostEstimate(
            flops=flops,
            transcendentals=2 * b_pad * hidden,            # two erf-GELU layers
            bytes_accessed=bytes_accessed,
        ),
    )(xT, w1, b1c, w2, b2c, w3c, b3s)

    return outT[:, :batch].T                               # (B, 1)


def init_params(key, input_dim, hidden_dim, output_dim, dtype=jnp.float32):
    """Deterministic synthetic init, torch layout: weight (out,in), bias (out,)."""
    ks = jax.random.split(key, 6)

    def lin(kw, kb, fan_in, fan_out):
        bound = 1.0 / (fan_in ** 0.5)
        w = jax.random.uniform(kw, (fan_out, fan_in), dtype, -bound, bound)
        b = jax.random.uniform(kb, (fan_out,), dtype, -bound, bound)
        return w, b

    w1, b1 = lin(ks[0], ks[1], input_dim, hidden_dim)
    w2, b2 = lin(ks[2], ks[3], hidden_dim, hidden_dim)
    w3, b3 = lin(ks[4], ks[5], hidden_dim, output_dim)
    return w1, b1, w2, b2, w3, b3


def _ref_forward(x, w1, b1, w2, b2, w3, b3):
    # Pure-JAX reference with the same exact-GELU semantics as torch.nn.GELU().
    h = _gelu_exact(x @ w1.T + b1)
    h = _gelu_exact(h @ w2.T + b2)
    return h @ w3.T + b3


if __name__ == "__main__":
    # Shapes implied by the module: hidden_dim = 8, output_dim = 1.
    batch, input_dim, hidden_dim, output_dim = 8, 6, 8, 1

    key = jax.random.PRNGKey(0)
    kx, kp, kx2 = jax.random.split(key, 3)
    x = jax.random.normal(kx, (batch, input_dim), jnp.float32)
    params = init_params(kp, input_dim, hidden_dim, output_dim)

    out = jax.block_until_ready(mlp_forward(x, *params))
    ref = _ref_forward(x, *params)
    assert out.shape == (batch, output_dim)
    assert jnp.allclose(out, ref, atol=1e-5, rtol=1e-5)

    # Also exercise the multi-step tiled-batch path (grid > 1, lane padding).
    big_batch = 2500
    x2 = jax.random.normal(kx2, (big_batch, input_dim), jnp.float32)
    out2 = jax.block_until_ready(mlp_forward(x2, *params))
    ref2 = _ref_forward(x2, *params)
    assert out2.shape == (big_batch, output_dim)
    assert jnp.allclose(out2, ref2, atol=1e-5, rtol=1e-5)

    print("KERNEL_OK")
</pallas_src>

<mosaic_0001>
module attributes {stable_mosaic.version = 11 : i64} {
  func.func @mlp_kernel(%arg0: i32, %arg1: memref<6x128xf32, #tpu.memory_space<vmem>>, %arg2: memref<8x6xf32, #tpu.memory_space<vmem>>, %arg3: memref<8x1xf32, #tpu.memory_space<vmem>>, %arg4: memref<8x8xf32, #tpu.memory_space<vmem>>, %arg5: memref<8x1xf32, #tpu.memory_space<vmem>>, %arg6: memref<8x1xf32, #tpu.memory_space<vmem>>, %arg7: memref<1x1xf32, #tpu.memory_space<smem>>, %arg8: memref<1x128xf32, #tpu.memory_space<vmem>>) attributes {dimension_semantics = [#tpu.dimension_semantics<parallel>], iteration_bounds = array<i64: 1>, scalar_prefetch = 0 : i64, scratch_operands = 0 : i64, tpu.core_type = #tpu.core_type<tc>, window_params = [{transform_indices = @transform_0, window_bounds = array<i64: 6, 128>}, {pipeline_mode = #tpu.pipeline_mode<synchronous>, transform_indices = @transform_1, window_bounds = array<i64: 8, 6>}, {pipeline_mode = #tpu.pipeline_mode<synchronous>, transform_indices = @transform_2, window_bounds = array<i64: 8, 1>}, {pipeline_mode = #tpu.pipeline_mode<synchronous>, transform_indices = @transform_3, window_bounds = array<i64: 8, 8>}, {pipeline_mode = #tpu.pipeline_mode<synchronous>, transform_indices = @transform_4, window_bounds = array<i64: 8, 1>}, {pipeline_mode = #tpu.pipeline_mode<synchronous>, transform_indices = @transform_5, window_bounds = array<i64: 8, 1>}, {transform_indices = @transform_6, window_bounds = array<i64: 1, 1>}, {transform_indices = @transform_7, window_bounds = array<i64: 1, 128>}]} {
    %c0 = arith.constant 0 : index
    %c0_0 = arith.constant 0 : index
    %0 = vector.load %arg1[%c0, %c0_0] : memref<6x128xf32, #tpu.memory_space<vmem>>, vector<6x128xf32>
    %c0_1 = arith.constant 0 : index
    %c0_2 = arith.constant 0 : index
    %1 = vector.load %arg2[%c0_1, %c0_2] : memref<8x6xf32, #tpu.memory_space<vmem>>, vector<8x6xf32>
    %cst = arith.constant dense<0.000000e+00> : vector<8x128xf32>
    %2 = tpu.matmul %1, %0, %cst {dimension_numbers = #tpu.dot_dimension_numbers<[1], [0], [0], [1], [0, 0, 1, 1], [], []>} : vector<8x6xf32>, vector<6x128xf32>, vector<8x128xf32> -> vector<8x128xf32>
    %c0_3 = arith.constant 0 : index
    %c0_4 = arith.constant 0 : index
    %3 = vector.load %arg3[%c0_3, %c0_4] : memref<8x1xf32, #tpu.memory_space<vmem>>, vector<8x1xf32>
    %4 = vector.broadcast %3 : vector<8x1xf32> to vector<8x128xf32>
    %5 = arith.addf %2, %4 : vector<8x128xf32>
    %cst_5 = arith.constant 5.000000e-01 : f32
    %6 = vector.broadcast %cst_5 : f32 to vector<8x128xf32>
    %7 = arith.mulf %6, %5 : vector<8x128xf32>
    %cst_6 = arith.constant 0.707106769 : f32
    %8 = vector.broadcast %cst_6 : f32 to vector<8x128xf32>
    %9 = arith.mulf %5, %8 : vector<8x128xf32>
    %10 = math.erf %9 : vector<8x128xf32>
    %cst_7 = arith.constant 1.000000e+00 : f32
    %11 = vector.broadcast %cst_7 : f32 to vector<8x128xf32>
    %12 = arith.addf %11, %10 : vector<8x128xf32>
    %13 = arith.mulf %7, %12 : vector<8x128xf32>
    %c0_8 = arith.constant 0 : index
    %c0_9 = arith.constant 0 : index
    %14 = vector.load %arg4[%c0_8, %c0_9] : memref<8x8xf32, #tpu.memory_space<vmem>>, vector<8x8xf32>
    %cst_10 = arith.constant dense<0.000000e+00> : vector<8x128xf32>
    %15 = tpu.matmul %14, %13, %cst_10 {dimension_numbers = #tpu.dot_dimension_numbers<[1], [0], [0], [1], [0, 0, 1, 1], [], []>} : vector<8x8xf32>, vector<8x128xf32>, vector<8x128xf32> -> vector<8x128xf32>
    %c0_11 = arith.constant 0 : index
    %c0_12 = arith.constant 0 : index
    %16 = vector.load %arg5[%c0_11, %c0_12] : memref<8x1xf32, #tpu.memory_space<vmem>>, vector<8x1xf32>
    %17 = vector.broadcast %16 : vector<8x1xf32> to vector<8x128xf32>
    %18 = arith.addf %15, %17 : vector<8x128xf32>
    %cst_13 = arith.constant 5.000000e-01 : f32
    %19 = vector.broadcast %cst_13 : f32 to vector<8x128xf32>
    %20 = arith.mulf %19, %18 : vector<8x128xf32>
    %cst_14 = arith.constant 0.707106769 : f32
    %21 = vector.broadcast %cst_14 : f32 to vector<8x128xf32>
    %22 = arith.mulf %18, %21 : vector<8x128xf32>
    %23 = math.erf %22 : vector<8x128xf32>
    %cst_15 = arith.constant 1.000000e+00 : f32
    %24 = vector.broadcast %cst_15 : f32 to vector<8x128xf32>
    %25 = arith.addf %24, %23 : vector<8x128xf32>
    %26 = arith.mulf %20, %25 : vector<8x128xf32>
    %c0_16 = arith.constant 0 : index
    %c0_17 = arith.constant 0 : index
    %27 = vector.load %arg6[%c0_16, %c0_17] : memref<8x1xf32, #tpu.memory_space<vmem>>, vector<8x1xf32>
    %28 = vector.broadcast %27 : vector<8x1xf32> to vector<8x128xf32>
    %29 = arith.mulf %26, %28 : vector<8x128xf32>
    %cst_18 = arith.constant dense<0.000000e+00> : vector<128xf32>
    %30 = vector.multi_reduction <add>, %29, %cst_18 [0] : vector<8x128xf32> to vector<128xf32>
    %31 = vector.shape_cast %30 : vector<128xf32> to vector<1x128xf32>
    %c0_19 = arith.constant 0 : index
    %c0_20 = arith.constant 0 : index
    %32 = memref.load %arg7[%c0_19, %c0_20] : memref<1x1xf32, #tpu.memory_space<smem>>
    %33 = vector.broadcast %32 : f32 to vector<1x128xf32>
    %34 = arith.addf %31, %33 : vector<1x128xf32>
    %c0_21 = arith.constant 0 : index
    %c0_22 = arith.constant 0 : index
    %35 = vector.load %arg8[%c0_21, %c0_22] : memref<1x128xf32, #tpu.memory_space<vmem>>, vector<1x128xf32>
    tpu.vector_store %arg8[%c0_21, %c0_22], %34 {strides = array<i32>} : memref<1x128xf32, #tpu.memory_space<vmem>>, vector<1x128xf32>,
    return
  }
  func.func @transform_0(%arg0: i32) -> (i32, i32) {
    %c0_i32 = arith.constant 0 : i32
    %c0_i32_0 = arith.constant 0 : i32
    return %c0_i32, %arg0 : i32, i32
  }
  func.func @transform_1(%arg0: i32) -> (i32, i32) {
    %c0_i32 = arith.constant 0 : i32
    %c0_i32_0 = arith.constant 0 : i32
    %c0_i32_1 = arith.constant 0 : i32
    return %c0_i32, %c0_i32_0 : i32, i32
  }
  func.func @transform_2(%arg0: i32) -> (i32, i32) {
    %c0_i32 = arith.constant 0 : i32
    %c0_i32_0 = arith.constant 0 : i32
    %c0_i32_1 = arith.constant 0 : i32
    return %c0_i32, %c0_i32_0 : i32, i32
  }
  func.func @transform_3(%arg0: i32) -> (i32, i32) {
    %c0_i32 = arith.constant 0 : i32
    %c0_i32_0 = arith.constant 0 : i32
    %c0_i32_1 = arith.constant 0 : i32
    return %c0_i32, %c0_i32_0 : i32, i32
  }
  func.func @transform_4(%arg0: i32) -> (i32, i32) {
    %c0_i32 = arith.constant 0 : i32
    %c0_i32_0 = arith.constant 0 : i32
    %c0_i32_1 = arith.constant 0 : i32
    return %c0_i32, %c0_i32_0 : i32, i32
  }
  func.func @transform_5(%arg0: i32) -> (i32, i32) {
    %c0_i32 = arith.constant 0 : i32
    %c0_i32_0 = arith.constant 0 : i32
    %c0_i32_1 = arith.constant 0 : i32
    return %c0_i32, %c0_i32_0 : i32, i32
  }
  func.func @transform_6(%arg0: i32) -> (i32, i32) {
    %c0_i32 = arith.constant 0 : i32
    %c0_i32_0 = arith.constant 0 : i32
    %c0_i32_1 = arith.constant 0 : i32
    return %c0_i32, %c0_i32_0 : i32, i32
  }
  func.func @transform_7(%arg0: i32) -> (i32, i32) {
    %c0_i32 = arith.constant 0 : i32
    %c0_i32_0 = arith.constant 0 : i32
    return %c0_i32, %arg0 : i32, i32
  }
}

</mosaic_0001>

<bundles_post_ra>
// kernel: mlp_forward.1
= control target key start
LH: loop header
LB: loop body
LE: loop exit
PB: predicated region body
PF: predicated region fallthrough
CT: control target
= control target key end

     0   :  { %vm39_vm0 = vcmask 1045504   ;;  %vm35_vm1 = vcmask 48128   ;;  %v251_v0 = vmov 0.0   ;;  %vm252_vm2 = vmmov 0   ;;  %s318_s0 = inlined_call_operand.vmem [shape: f32[6,128], index: 0, kind: input, shape index: {}]   ;;  %s319_s1 = inlined_call_operand.vmem [shape: f32[8,6], index: 1, kind: input, shape index: {}]   ;;  %s320_s2 = inlined_call_operand.vmem [shape: f32[8,1], index: 2, kind: input, shape index: {}]   ;;  %s321_s4 = inlined_call_operand.vmem [shape: f32[8,1], index: 4, kind: input, shape index: {}]   ;;  %s322_s5 = inlined_call_operand.vmem [shape: f32[8,1], index: 5, kind: input, shape index: {}]   ;;  %s323_s3 = inlined_call_operand.vmem [shape: f32[8,8], index: 3, kind: input, shape index: {}]   ;;  %s324_s6 = inlined_call_operand.<no memory space> [shape: f32[1,1], index: 6, kind: input, shape index: {}]   ;;  %s325_s7 = inlined_call_operand.vmem [shape: f32[1,128], index: 7, kind: output, shape index: {}]  }
   0x1   :  { %232 = vmatprep.subr.mxu0 %v251_v0  ;;  %v27_v1 = vld [vmem:[%s318_s0] sm:$0x3f]  ;;  %234 = vmatprep.mubr.msk.f32.mxu0 %vm252_vm2, %v251_v0  ;;  %v253_v4 = vmov 0   ;;  %vm125_vm3 = vcmask 64512   ;;  %v218_v33 = vstv %s324_s6 }
   0x2   :  { %v28_v2 = vld [vmem:[%s319_s1] sm:$0xff]  ;;  %233 = vmatpush3.msk.msra.mxu0 %vm39_vm0, %v27_v1  ;;  %245 = vset.pattern.permute.xlu0 %v253_v4 }
   0x3   :  { %v29_v3 = vld [vmem:[%s320_s2] sm:$0xff]  ;;  %235 = vmatmul.mubr.msk.f32.vlgmr.msra.gmra.mrb[0].mxu0 %vm35_vm1, %v28_v2  ;;  %237 = vmatprep.subr.mxu1 %v251_v0 }
   0x4   :  { %32 = vperm.xlu0 %245, %v29_v3   ;;  %v119_v5 = vld [vmem:[%s321_s4] sm:$0xff]  ;;  %239 = vmatprep.mubr.msk.f32.mxu1 %vm252_vm2, %v251_v0 }
   0x5   :  { %246 = vset.pattern.permute.xlu1 %v253_v4  ;;  %v204_v6 = vld [vmem:[%s322_s5] sm:$0xff] }
   0x6   :  { %207 = vperm.xlu1 %246, %v204_v6   ;;  %v118_v16 = vld [vmem:[%s323_s3] sm:$0xff] }
   0x8   :  { %122 = vperm.xlu0 %245, %v119_v5  }
  0x83   :  { %v33_v7 = vpop.permute.xlu0 %32 }
  0x85   :  { %v208_v25 = vpop.permute.xlu1 %207 }
  0x87   :  { %v123_v17 = vpop.permute.xlu0 %122 }
  0xd6   :  { %v109_v8 = vpop.f32.mrb[0].mxu0 }
  0xd7   :  { %v110_v9 = vadd.f32 %v109_v8, %v33_v7  ;;  %v236_v10 = vpop.f32.mrb[1].mxu0 }
  0xd9   :  { %v114_v11 = vmul.f32 0.70710677, %v110_v9  ;;  %v113_v13 = vmul.f32 0.5, %v110_v9 }
  0xdb   :  { %247 = verf.f32 %v114_v11 }
  0xe5   :  { %v248_v12 = vpop.eup %247 }
  0xe6   :  { %v116_v14 = vadd.f32 1.0, %v248_v12 }
  0xe8   :  { %v117_v15 = vmul.f32 %v116_v14, %v113_v13 }
  0xea   :  { %238 = vmatpush3.msra.mxu1 %v117_v15 }
  0xeb   :  { %240 = vmatmul.mubr.msk.f32.vlgmr.msra.gmra.mrb[0].mxu1 %vm125_vm3, %v118_v16 }
 0x1be   :  { %v195_v18 = vpop.f32.mrb[0].mxu1 }
 0x1bf   :  { %v196_v19 = vadd.f32 %v195_v18, %v123_v17  ;;  %v241_v20 = vpop.f32.mrb[1].mxu1 }
 0x1c1   :  { %v200_v21 = vmul.f32 0.70710677, %v196_v19  ;;  %v199_v23 = vmul.f32 0.5, %v196_v19 }
 0x1c3   :  { %249 = verf.f32 %v200_v21 }
 0x1cd   :  { %v250_v22 = vpop.eup %249 }
 0x1ce   :  { %v202_v24 = vadd.f32 1.0, %v250_v22 }
 0x1d0   :  { %v203_v26 = vmul.f32 %v202_v24, %v199_v23 }
 0x1d2   :  { %v210_v27 = vmul.f32 %v208_v25, %v203_v26 }
 0x1d4   :  { %v211_v28 = vrot.slane %v210_v27, 4 }
 0x1d6   :  { %v212_v29 = vadd.f32 %v211_v28, %v210_v27 }
 0x1d8   :  { %v213_v30 = vrot.slane %v212_v29, 2 }
 0x1da   :  { %v214_v31 = vadd.f32 %v213_v30, %v212_v29 }
 0x1dc   :  { %v215_v32 = vrot.slane %v214_v31, 1 }
 0x1de   :  { %v216_v34 = vadd.f32 %v215_v32, %v214_v31 }
 0x1e0   :  { %v219_v35 = vadd.f32 %v218_v33, %v216_v34 }
 0x1e2   :  { %220 = vst [vmem:[%s325_s7] sm:$0x1] %v219_v35 }

</bundles_post_ra>
